<compile_context>
chip_gen: v7x
topology: tpu7x:2x2x1
jax: 0.10.0
libtpu: 0.0.40
codegen_flags: <defaults>
</compile_context>

<pallas_src>
import functools

import jax
import jax.numpy as jnp
import numpy as np
from jax.experimental import pallas as pl
from jax.experimental.pallas import tpu as pltpu


NUM_PARTS = 2                          # one partial accumulator per TensorCore
_LOGITS_BUF_BUDGET = 8 * 1024 * 1024   # bytes per pipelined logits buffer


def _label_smooth_kernel(logits_ref, tgt_ref, out_ref, acc_ref, *,
                         confidence, eps, n_classes, tiles_main,
                         tiles_per_part):
    p = pl.program_id(0)
    r = pl.program_id(1)

    @pl.when(r == 0)
    def _init():
        acc_ref[...] = jnp.zeros_like(acc_ref)

    # Tile indices past the real data (possible when tiles_main is not a
    # multiple of NUM_PARTS) are clamped in the index_map; skip their compute.
    @pl.when(p * tiles_per_part + r < tiles_main)
    def _compute():
        x = logits_ref[...].astype(jnp.float32)                  # (R, C)
        tgt = tgt_ref[...]                                       # (R, 1) int32

        # --- logsumexp over the class axis ---
        m = jnp.max(x, axis=-1, keepdims=True)                   # (R, 1)
        se = jnp.sum(jnp.exp(x - m), axis=-1, keepdims=True)     # (R, 1)
        lse = m + jnp.log(se)                                    # (R, 1)

        # --- fused label-smoothed CE: never materialize lp = x - lse ---
        class_idx = jax.lax.broadcasted_iota(jnp.int32, x.shape, 1)
        onehot = class_idx == tgt                                # (R, C)
        x_tgt = jnp.sum(jnp.where(onehot, x, 0.0), axis=-1, keepdims=True)
        sum_x = jnp.sum(x, axis=-1, keepdims=True)

        lp_tgt = x_tgt - lse                                     # log p[target]
        lp_sum = sum_x - n_classes * lse                         # sum_c log p[c]

        per_row = -(confidence * lp_tgt + eps * (lp_sum - lp_tgt))   # (R, 1)

        # rows dropped by pack_padded_sequence / padding carry tgt = -1
        valid = tgt >= 0
        acc_ref[...] += jnp.where(valid, per_row, 0.0)

    @pl.when(r == pl.num_programs(1) - 1)
    def _finalize():
        total = jnp.sum(acc_ref[...], axis=0, keepdims=True)     # (1, 1)
        out_ref[...] = total[None]                               # (1, 1, 1)


def _choose_tile_rows(n_rows, n_classes, itemsize):
    """Largest multiple-of-8 row tile that keeps a logits buffer <= budget."""
    per_row = max(1, n_classes * itemsize)
    tile = _LOGITS_BUF_BUDGET // per_row
    tile = max(8, min(512, (tile // 8) * 8))
    # Small problems: shrink so each partial-sum part gets at least one full
    # tile (keeps rows on the Pallas path; the un-tiled tail stays < tile).
    if n_rows < NUM_PARTS * tile:
        tile = max(8, (n_rows // (NUM_PARTS * 8)) * 8)
    return tile


def _rows_loss_sum(x, tgt, *, confidence, eps, n_classes):
    """Pure-JAX label-smoothed CE sum over rows with tgt >= 0 (ragged tail)."""
    x = x.astype(jnp.float32)                                    # (r, C)
    m = jnp.max(x, axis=-1, keepdims=True)
    lse = m + jnp.log(jnp.sum(jnp.exp(x - m), axis=-1, keepdims=True))
    x_tgt = jnp.take_along_axis(x, jnp.maximum(tgt, 0), axis=-1)  # (r, 1)
    sum_x = jnp.sum(x, axis=-1, keepdims=True)
    lp_tgt = x_tgt - lse
    lp_sum = sum_x - n_classes * lse
    per_row = -(confidence * lp_tgt + eps * (lp_sum - lp_tgt))
    return jnp.sum(jnp.where(tgt >= 0, per_row, 0.0))


def label_smoothing_loss(logits, targets, lengths, *, classes, smoothing=0.0):
    """Equivalent of LabelSmoothingLoss.forward given already-argmaxed targets.

    logits: (B, T, C) float (f32 or bf16 — math is done in f32 in-kernel)
    targets: (B, T) int
    lengths: (B,) int  (pack_padded_sequence keeps t < lengths + 1 per row)
    """
    B, T, C = logits.shape
    assert C == classes
    confidence = 1.0 - smoothing
    eps = smoothing / (classes - 1)

    lengths = lengths.astype(jnp.int32)
    # Clamp lengths+1 to T (PyTorch's pack_padded_sequence would raise if it
    # exceeded T) so the in-kernel mask and the denominator always agree.
    eff_len = jnp.minimum(lengths + 1, T)                        # (B,)
    t_idx = jnp.arange(T, dtype=jnp.int32)[None, :]
    valid = t_idx < eff_len[:, None]                             # (B, T)
    tgt = jnp.where(valid, targets.astype(jnp.int32), -1)        # (B, T)

    n_rows = B * T
    logits_flat = logits.reshape(n_rows, C)
    tgt_flat = tgt.reshape(n_rows, 1)

    tile_rows = _choose_tile_rows(n_rows, C, jnp.dtype(logits.dtype).itemsize)
    tiles_main = n_rows // tile_rows          # full row-tiles handled by Pallas
    n_main = tiles_main * tile_rows

    total = jnp.zeros((), jnp.float32)

    if tiles_main > 0:
        tiles_per_part = -(-tiles_main // NUM_PARTS)

        kernel = functools.partial(
            _label_smooth_kernel, confidence=confidence, eps=eps, n_classes=C,
            tiles_main=tiles_main, tiles_per_part=tiles_per_part)

        def row_map(p, r):
            # Clamp so every issued DMA is a fully in-bounds full tile; the
            # kernel skips the (at most NUM_PARTS-1) excess tiles via pl.when.
            return (jnp.minimum(p * tiles_per_part + r, tiles_main - 1), 0)

        partials = pl.pallas_call(
            kernel,
            out_shape=jax.ShapeDtypeStruct((NUM_PARTS, 1, 1), jnp.float32),
            grid_spec=pltpu.PrefetchScalarGridSpec(
                num_scalar_prefetch=0,
                grid=(NUM_PARTS, tiles_per_part),
                in_specs=[
                    pl.BlockSpec((tile_rows, C), row_map),
                    pl.BlockSpec((tile_rows, 1), row_map),
                ],
                out_specs=pl.BlockSpec((1, 1, 1), lambda p, r: (p, 0, 0)),
                scratch_shapes=[pltpu.VMEM((tile_rows, 1), jnp.float32)],
            ),
            compiler_params=pltpu.CompilerParams(
                dimension_semantics=("parallel", "arbitrary"),
                vmem_limit_bytes=32 * 1024 * 1024),
        )(logits_flat, tgt_flat)
        total = total + jnp.sum(partials)

    if n_main < n_rows:
        # Ragged tail (< tile_rows rows): tiny pure-JAX reduction, no padding
        # copy of the full logits array.
        total = total + _rows_loss_sum(
            logits_flat[n_main:], tgt_flat[n_main:],
            confidence=confidence, eps=eps, n_classes=C)

    # torch.mean over packed rows == masked sum / number of packed rows.
    n_packed = jnp.sum(eff_len).astype(jnp.float32)
    return total / n_packed


def _reference(logits, targets, lengths, classes, smoothing):
    """Pure-JAX reference of the PyTorch forward."""
    B, T, C = logits.shape
    lp = jax.nn.log_softmax(logits.astype(jnp.float32), axis=-1)
    conf = 1.0 - smoothing
    eps = smoothing / (classes - 1)
    true_dist = jnp.full((B, T, C), eps, dtype=jnp.float32)
    true_dist = true_dist.at[jnp.arange(B)[:, None],
                             jnp.arange(T)[None, :],
                             targets].set(conf)
    per_pos = jnp.sum(-true_dist * lp, axis=-1)                  # (B, T)
    eff = jnp.minimum(lengths + 1, T)
    mask = jnp.arange(T)[None, :] < eff[:, None]
    return jnp.sum(jnp.where(mask, per_pos, 0.0)) / jnp.sum(eff)


if __name__ == "__main__":
    smoothing = 0.1
    key = jax.random.PRNGKey(0)

    loss_fn = jax.jit(label_smoothing_loss,
                      static_argnames=("classes", "smoothing"))

    cases = [
        (2, 8, 128, [7, 5]),            # rows exactly fill the tiles, no tail
        (3, 5, 128, [4, 3, 2]),         # excess part-tile skip + JAX tail rows
        (4, 37, 256, [36, 20, 11, 5]),  # multi-row tiles on both parts + tail
    ]
    for (B, T, C, lens) in cases:
        key, k_text, k_logits = jax.random.split(key, 3)
        # batch.text: (B, T+1, C); targets = batch.text.argmax(-1)[:, 1:] (glue)
        text = jax.random.normal(k_text, (B, T + 1, C), dtype=jnp.float32)
        targets = jnp.argmax(text, axis=-1)[:, 1:]               # (B, T)
        # train_outputs (logits): (B, T, C)
        logits = jax.random.normal(k_logits, (B, T, C), dtype=jnp.float32)
        # batch.lengths (sorted descending, lengths + 1 <= T)
        lengths = jnp.array(lens, dtype=jnp.int32)

        loss = jax.block_until_ready(
            loss_fn(logits, targets, lengths, classes=C, smoothing=smoothing))
        ref = _reference(logits, targets, lengths, C, smoothing)
        np.testing.assert_allclose(np.asarray(loss), np.asarray(ref),
                                   rtol=1e-5, atol=1e-5)

    print("KERNEL_OK")
</pallas_src>

<mosaic_0001>
module attributes {stable_mosaic.version = 11 : i64} {
  func.func @_label_smooth_kernel(%arg0: i32, %arg1: i32, %arg2: memref<8x128xf32, #tpu.memory_space<vmem>>, %arg3: memref<8x1xi32, #tpu.memory_space<vmem>>, %arg4: memref<1x1x1xf32, #tpu.memory_space<vmem>>, %arg5: memref<8x1xf32, #tpu.memory_space<vmem>>) attributes {dimension_semantics = [#tpu.dimension_semantics<parallel>, #tpu.dimension_semantics<arbitrary>], iteration_bounds = array<i64: 2, 1>, scalar_prefetch = 0 : i64, scratch_operands = 1 : i64, tpu.core_type = #tpu.core_type<tc>, window_params = [{transform_indices = @transform_0, window_bounds = array<i64: 8, 128>}, {transform_indices = @transform_1, window_bounds = array<i64: 8, 1>}, {transform_indices = @transform_2, window_bounds = array<i64: 1, 1, 1>}]} {
    %c0_i32 = arith.constant 0 : i32
    %0 = arith.cmpi eq, %arg1, %c0_i32 : i32
    %1 = arith.extui %0 : i1 to i32
    %c0_i32_0 = arith.constant 0 : i32
    %2 = arith.cmpi ne, %1, %c0_i32_0 : i32
    scf.if %2 {
      %cst = arith.constant 0.000000e+00 : f32
      %11 = vector.broadcast %cst : f32 to vector<8x1xf32>
      %c0 = arith.constant 0 : index
      %c0_4 = arith.constant 0 : index
      %12 = vector.load %arg5[%c0, %c0_4] : memref<8x1xf32, #tpu.memory_space<vmem>>, vector<8x1xf32>
      tpu.vector_store %arg5[%c0, %c0_4], %11 {strides = array<i32>} : memref<8x1xf32, #tpu.memory_space<vmem>>, vector<8x1xf32>,
    } else {
    }
    %c1_i32 = arith.constant 1 : i32
    %3 = arith.muli %arg0, %c1_i32 : i32
    %4 = arith.addi %3, %arg1 : i32
    %c2_i32 = arith.constant 2 : i32
    %5 = arith.cmpi slt, %4, %c2_i32 : i32
    %6 = arith.extui %5 : i1 to i32
    %c0_i32_1 = arith.constant 0 : i32
    %7 = arith.cmpi ne, %6, %c0_i32_1 : i32
    scf.if %7 {
      %c0 = arith.constant 0 : index
      %c0_4 = arith.constant 0 : index
      %11 = vector.load %arg2[%c0, %c0_4] : memref<8x128xf32, #tpu.memory_space<vmem>>, vector<8x128xf32>
      %c0_5 = arith.constant 0 : index
      %c0_6 = arith.constant 0 : index
      %12 = vector.load %arg3[%c0_5, %c0_6] : memref<8x1xi32, #tpu.memory_space<vmem>>, vector<8x1xi32>
      %cst = arith.constant dense<0xFF800000> : vector<8xf32>
      %13 = vector.multi_reduction <maximumf>, %11, %cst [1] : vector<8x128xf32> to vector<8xf32>
      %14 = vector.shape_cast %13 : vector<8xf32> to vector<8x1xf32>
      %15 = vector.broadcast %14 : vector<8x1xf32> to vector<8x128xf32>
      %16 = arith.subf %11, %15 : vector<8x128xf32>
      %17 = math.exp %16 : vector<8x128xf32>
      %cst_7 = arith.constant dense<0.000000e+00> : vector<8xf32>
      %18 = vector.multi_reduction <add>, %17, %cst_7 [1] : vector<8x128xf32> to vector<8xf32>
      %19 = vector.shape_cast %18 : vector<8xf32> to vector<8x1xf32>
      %20 = math.log %19 : vector<8x1xf32>
      %21 = arith.addf %14, %20 : vector<8x1xf32>
      %22 = tpu.iota {dimensions = array<i32: 1>} : vector<8x128xi32>
      %23 = vector.broadcast %12 : vector<8x1xi32> to vector<8x128xi32>
      %24 = arith.cmpi eq, %22, %23 : vector<8x128xi32>
      %cst_8 = arith.constant 0.000000e+00 : f32
      %25 = vector.broadcast %cst_8 : f32 to vector<8x128xf32>
      %26 = arith.select %24, %11, %25 : vector<8x128xi1>, vector<8x128xf32>
      %cst_9 = arith.constant dense<0.000000e+00> : vector<8xf32>
      %27 = vector.multi_reduction <add>, %26, %cst_9 [1] : vector<8x128xf32> to vector<8xf32>
      %28 = vector.shape_cast %27 : vector<8xf32> to vector<8x1xf32>
      %cst_10 = arith.constant dense<0.000000e+00> : vector<8xf32>
      %29 = vector.multi_reduction <add>, %11, %cst_10 [1] : vector<8x128xf32> to vector<8xf32>
      %30 = vector.shape_cast %29 : vector<8xf32> to vector<8x1xf32>
      %31 = arith.subf %28, %21 : vector<8x1xf32>
      %cst_11 = arith.constant 1.280000e+02 : f32
      %32 = vector.broadcast %cst_11 : f32 to vector<8x1xf32>
      %33 = arith.mulf %32, %21 : vector<8x1xf32>
      %34 = arith.subf %30, %33 : vector<8x1xf32>
      %cst_12 = arith.constant 0.899999976 : f32
      %35 = vector.broadcast %cst_12 : f32 to vector<8x1xf32>
      %36 = arith.mulf %35, %31 : vector<8x1xf32>
      %37 = arith.subf %34, %31 : vector<8x1xf32>
      %cst_13 = arith.constant 7.87401571E-4 : f32
      %38 = vector.broadcast %cst_13 : f32 to vector<8x1xf32>
      %39 = arith.mulf %38, %37 : vector<8x1xf32>
      %40 = arith.addf %36, %39 : vector<8x1xf32>
      %cst_14 = arith.constant 0.000000e+00 : f32
      %41 = vector.broadcast %cst_14 : f32 to vector<8x1xf32>
      %42 = arith.subf %41, %40 : vector<8x1xf32>
      %c0_i32_15 = arith.constant 0 : i32
      %43 = vector.broadcast %c0_i32_15 : i32 to vector<8x1xi32>
      %44 = arith.cmpi sge, %12, %43 : vector<8x1xi32>
      %c0_16 = arith.constant 0 : index
      %c0_17 = arith.constant 0 : index
      %45 = vector.load %arg5[%c0_16, %c0_17] : memref<8x1xf32, #tpu.memory_space<vmem>>, vector<8x1xf32>
      %cst_18 = arith.constant 0.000000e+00 : f32
      %46 = vector.broadcast %cst_18 : f32 to vector<8x1xf32>
      %47 = arith.select %44, %42, %46 : vector<8x1xi1>, vector<8x1xf32>
      %48 = arith.addf %45, %47 : vector<8x1xf32>
      %c0_19 = arith.constant 0 : index
      %c0_20 = arith.constant 0 : index
      %49 = vector.load %arg5[%c0_19, %c0_20] : memref<8x1xf32, #tpu.memory_space<vmem>>, vector<8x1xf32>
      tpu.vector_store %arg5[%c0_19, %c0_20], %48 {strides = array<i32>} : memref<8x1xf32, #tpu.memory_space<vmem>>, vector<8x1xf32>,
    } else {
    }
    %c0_i32_2 = arith.constant 0 : i32
    %8 = arith.cmpi eq, %arg1, %c0_i32_2 : i32
    %9 = arith.extui %8 : i1 to i32
    %c0_i32_3 = arith.constant 0 : i32
    %10 = arith.cmpi ne, %9, %c0_i32_3 : i32
    scf.if %10 {
      %c0 = arith.constant 0 : index
      %c0_4 = arith.constant 0 : index
      %11 = vector.load %arg5[%c0, %c0_4] : memref<8x1xf32, #tpu.memory_space<vmem>>, vector<8x1xf32>
      %cst = arith.constant dense<0.000000e+00> : vector<1xf32>
      %12 = vector.multi_reduction <add>, %11, %cst [0] : vector<8x1xf32> to vector<1xf32>
      %13 = vector.shape_cast %12 : vector<1xf32> to vector<1x1xf32>
      %14 = vector.shape_cast %13 : vector<1x1xf32> to vector<1x1x1xf32>
      %c0_5 = arith.constant 0 : index
      %c0_6 = arith.constant 0 : index
      %c0_7 = arith.constant 0 : index
      %15 = vector.load %arg4[%c0_5, %c0_6, %c0_7] : memref<1x1x1xf32, #tpu.memory_space<vmem>>, vector<1x1x1xf32>
      tpu.vector_store %arg4[%c0_5, %c0_6, %c0_7], %14 {strides = array<i32>} : memref<1x1x1xf32, #tpu.memory_space<vmem>>, vector<1x1x1xf32>,
    } else {
    }
    return
  }
  func.func @transform_0(%arg0: i32, %arg1: i32) -> (i32, i32) {
    %c1_i32 = arith.constant 1 : i32
    %0 = arith.muli %arg0, %c1_i32 : i32
    %1 = arith.addi %0, %arg1 : i32
    %c1_i32_0 = arith.constant 1 : i32
    %2 = arith.minsi %1, %c1_i32_0 : i32
    %c0_i32 = arith.constant 0 : i32
    %c0_i32_1 = arith.constant 0 : i32
    return %2, %c0_i32 : i32, i32
  }
  func.func @transform_1(%arg0: i32, %arg1: i32) -> (i32, i32) {
    %c1_i32 = arith.constant 1 : i32
    %0 = arith.muli %arg0, %c1_i32 : i32
    %1 = arith.addi %0, %arg1 : i32
    %c1_i32_0 = arith.constant 1 : i32
    %2 = arith.minsi %1, %c1_i32_0 : i32
    %c0_i32 = arith.constant 0 : i32
    %c0_i32_1 = arith.constant 0 : i32
    return %2, %c0_i32 : i32, i32
  }
  func.func @transform_2(%arg0: i32, %arg1: i32) -> (i32, i32, i32) {
    %c0_i32 = arith.constant 0 : i32
    %c0_i32_0 = arith.constant 0 : i32
    %c0_i32_1 = arith.constant 0 : i32
    return %arg0, %c0_i32, %c0_i32_0 : i32, i32, i32
  }
}

</mosaic_0001>

<bundles_post_ra>
// kernel: label_smoothing_loss.1
= control target key start
LH: loop header
LB: loop body
LE: loop exit
PB: predicated region body
PF: predicated region fallthrough
CT: control target
= control target key end

     0   :  { %s425_s9 = smov 0   ;;  %s427_s10 = smov 0   ;;  %s473_s0 = inlined_call_operand.vmem [shape: f32[16,128], index: 0, kind: input, shape index: {}]   ;;  %s474_s1 = inlined_call_operand.vmem [shape: s32[16,1], index: 1, kind: input, shape index: {}]   ;;  %s475_s2 = inlined_call_operand.vmem [shape: f32[2,1,1], index: 2, kind: output, shape index: {}]  }
   0x1   :  { %s429_s11 = smov 0  }
   0x2 LB: > { %s24_s12 = sadd.s32 1, %s402_s10  ;;  %p341_p0 = scmp.ge.s32.totalorder %s406_s11, 1  ;;  %s406_s11 = sphi %s429_s11, %s12_s11   ;;  %s402_s10 = sphi %s427_s10, %s477_s10   ;;  %s398_s9 = sphi %s425_s9, %s476_s9  }
   0x3   : > { %p26_p1 = scmp.ge.s32.totalorder %s24_s12, 2  ;;  %p156_p2 = scmp.lt.s32.totalorder %s406_s11, 3 }
   0x5   : > { %s479_s12 = smov (%p26_p1, %s24_s12), 0  ;;  %p157_p3 = pnand %p341_p0, %p156_p2 }
   0x6   : > { %p186_p4 = scmp.lt.s32.totalorder (!%p157_p3), %s398_s9, 1  ;;  %vm212_vm0 = vcmask (!%p157_p3), 7168   ;;  %v408_v0 = vmov (!%p157_p3), 0.0   ;;  %p350_p5 = scmp.ge.s32.totalorder (!%p157_p3), %s398_s9, 2 }
   0x7   : > { %160 = sbr.rel (%p157_p3) target bundleno = 372 (0x174), region = 28  ;;  %213 = vst.msk [vmem:[#allocation2] sm:$0xff] (!%p157_p3), %vm212_vm0, %v408_v0 }
   0xe   : > { %s444_s13 = scalar_select %p186_p4, %s398_s9, 1 }
   0xf   : > { %218 = sbr.rel (%p350_p5) target bundleno = 351 (0x15f), region = 36  ;;  %v409_v2 = vmov (!%p350_p5), 0   ;;  %v231_v7 = vlaneseq (!%p350_p5)  ;;  %v251_v25 = vld [vmem:[#allocation2] sm:$0xff] (!%p350_p5) }
  0x10   : > { %s189_s14 = scalar_select %p186_p4, %s444_s13, 1 }
  0x11   : > { %s207_s17 = scalar_lea.vmem %s475_s2, %s444_s13  ;;  %379 = vset.pattern.permute.xlu0 (!%p350_p5), %v409_v2  ;;  %v232_v8 = vand.u32 (!%p350_p5), 127, %v231_v7 }
  0x12   : > { %s345_s18 = sshll.u32 %s189_s14, 3 }
  0x13   : > { %s191_s21 = scalar_lea.vmem %s473_s0, %s345_s18  ;;  %s201_s24 = scalar_lea.vmem %s474_s1, %s345_s18 }
  0x14   : > { %v219_v1 = vld [vmem:[%s191_s21] sm:$0xff] (!%p350_p5) }
  0x15   : > { %221 = vmax.xlane.f32.xlu0 (!%p350_p5), %v219_v1  ;;  %v220_v3 = vld [vmem:[%s201_s24] sm:$0xff] (!%p350_p5) }
  0x16   : > { %vm250_vm2 = vcmp.ge.s32.totalorder %v220_v3, 0 }
  0x2b   : > { %234 = vperm.xlu0 %379, %v220_v3  }
  0xa2   : > { %v222_v4 = vpop.xlane.xlu0 %221 }
  0xa3   : > { %v223_v5 = vsub.f32 %v219_v1, %v222_v4 }
  0xa5   : > { %v224_v6 = vmul.f32 1.442695, %v223_v5 }
  0xa7   : > { %380 = vpow2.f32 %v224_v6 }
  0xaa   : > { %v235_v9 = vpop.permute.xlu0 %234 }
  0xab   : > { %vm236_vm1 = vcmp.eq.s32.totalorder %v232_v8, %v235_v9 }
  0xac   : > { %v237_v11 = vsel %vm236_vm1, %v219_v1, 0.0 }
  0xb1   : > { %v381_v10 = vpop.eup %380 }
  0xb2   : > { %226 = vadd.xlane.f32.xlu1 %v381_v10 }
  0xb6   : > { %238 = vadd.xlane.f32.xlu1 %v237_v11 }
  0xba   : > { %240 = vadd.xlane.f32.xlu1 %v219_v1 }
 0x13f   : > { %v227_v12 = vpop.xlane.xlu1 %226 }
 0x140   : > { %382 = vlog2.f32 %v227_v12 }
 0x143   : > { %v239_v13 = vpop.xlane.xlu1 %238 }
 0x147   : > { %v241_v17 = vpop.xlane.xlu1 %240 }
 0x14a   : > { %v383_v14 = vpop.eup %382 }
 0x14b   : > { %v229_v15 = vmul.f32 0.6931472, %v383_v14 }
 0x14d   : > { %v230_v16 = vadd.f32 %v229_v15, %v222_v4 }
 0x14f   : > { %v243_v18 = vmul.f32 128.0, %v230_v16  ;;  %v242_v19 = vsub.f32 %v239_v13, %v230_v16 }
 0x151   : > { %v244_v20 = vsub.f32 %v241_v17, %v243_v18  ;;  %v245_v22 = vmul.f32 0.9, %v242_v19 }
 0x153   : > { %v246_v21 = vsub.f32 %v244_v20, %v242_v19 }
 0x155   : > { %v247_v23 = vmul.f32 0.0007874016, %v246_v21 }
 0x157   : > { %v248_v24 = vadd.f32 %v247_v23, %v245_v22 }
 0x159   : > { %v249_v26 = vsub.f32 0.0, %v248_v24 }
 0x15b   : > { %v252_v27 = vsel %vm250_vm2, %v249_v26, 0.0 }
 0x15c   : > { %v253_v28 = vadd.f32 %v252_v27, %v251_v25 }
 0x15e   : > { %255 = vst.msk [vmem:[#allocation2] sm:$0xff] %vm212_vm0, %v253_v28 }
 0x15f PF: > { %vm268_vm3 = vcmask 0  }
 0x165   : > { %v259_v29 = vld [vmem:[#allocation2] sm:$0xff] }
 0x166   : > { %v261_v30 = vsel %vm212_vm0, %v259_v29, 0.0 }
 0x167   : > { %v262_v31 = vrot.slane %v261_v30, 4 }
 0x169   : > { %v263_v32 = vadd.f32 %v262_v31, %v261_v30 }
 0x16b   : > { %v264_v33 = vrot.slane %v263_v32, 2 }
 0x16d   : > { %v265_v34 = vadd.f32 %v264_v33, %v263_v32 }
 0x16f   : > { %v266_v35 = vrot.slane %v265_v34, 1 }
 0x171   : > { %v267_v36 = vadd.f32 %v266_v35, %v265_v34 }
 0x173   : > { %269 = vst.msk [vmem:[%s207_s17] sm:$0x1] %vm268_vm3, %v267_v36 }
 0x174 PF: > { %s12_s11 = sadd.s32 1, %s406_s11   ;;  %s476_s9 = smov %s402_s10 }
 0x175   : > { %p9_p6 = scmp.ge.s32.totalorder %s12_s11, 4   ;;  %s477_s10 = smov %s479_s12 }
 0x177   :  { %11 = sbr.rel (!%p9_p6) target bundleno = 2 (0x2), region = 73 }

</bundles_post_ra>
